<compile_context>
chip_gen: v7x
topology: tpu7x:2x2x1
jax: 0.10.0
libtpu: 0.0.40
codegen_flags: <defaults>
</compile_context>

<pallas_src>
import jax
import jax.numpy as jnp
from jax.experimental import pallas as pl
from jax.experimental.pallas import tpu as pltpu

LANE = 128      # lane width / padded output features
HIDDEN = 64     # hidden layer size of the module
MAX_TB = 1024   # max batch-tile rows (well within VMEM on v5e/v6e/v7x)


def _qnet_kernel(x_ref, w1_ref, b1_ref, w2_ref, b2_ref, w3_ref, b3_ref, o_ref):
    """Fused 3-layer MLP on one [TB, S] batch tile (weights VMEM-resident)."""
    # fc1 + ReLU  (K=4 is tiny; one MXU pass, f32 accumulate)
    x = x_ref[...].astype(jnp.bfloat16)
    h1 = jnp.dot(x, w1_ref[...], preferred_element_type=jnp.float32) + b1_ref[...]
    h1 = jnp.maximum(h1, 0.0)
    # fc2 + ReLU
    h2 = jnp.dot(h1.astype(jnp.bfloat16), w2_ref[...],
                 preferred_element_type=jnp.float32) + b2_ref[...]
    h2 = jnp.maximum(h2, 0.0)
    # fc3 (no activation) -> lane-dense [TB, 128] store (zero-padded actions)
    out = jnp.dot(h2.astype(jnp.bfloat16), w3_ref[...],
                  preferred_element_type=jnp.float32) + b3_ref[...]
    o_ref[...] = out.astype(o_ref.dtype)


@jax.jit
def qnetwork_forward(x, params):
    """QNetwork forward pass via a single batched pallas_call.

    x: [B, state_dim] float32
    params: dict with w1 [S,64], b1 [1,64], w2 [64,64], b2 [1,64],
            w3 [64,A], b3 [1,A]   (A = num_actions)
    returns: [B, A] float32 Q-values
    """
    w1 = params["w1"].astype(jnp.bfloat16)
    w2 = params["w2"].astype(jnp.bfloat16)
    b1 = params["b1"].astype(jnp.float32)
    b2 = params["b2"].astype(jnp.float32)

    batch, state_dim = x.shape
    hidden = w1.shape[1]
    num_actions = params["w3"].shape[1]

    # Lane-dense output: pad fc3 to 128 output features with zeros.
    w3p = jnp.zeros((hidden, LANE), jnp.bfloat16).at[:, :num_actions].set(
        params["w3"].astype(jnp.bfloat16))
    b3p = jnp.zeros((1, LANE), jnp.float32).at[:, :num_actions].set(
        params["b3"].astype(jnp.float32))

    # Batch tile: up to MAX_TB rows, rounded to a multiple of 8 (sublanes).
    tb = min(MAX_TB, max(8, ((batch + 7) // 8) * 8))
    b_pad = ((batch + tb - 1) // tb) * tb
    if b_pad != batch:
        x = jnp.pad(x, ((0, b_pad - batch), (0, 0)))

    grid = (b_pad // tb,)
    weight_spec = lambda shape: pl.BlockSpec(shape, lambda i: (0, 0))

    flops = 2 * b_pad * (state_dim * hidden + hidden * hidden + hidden * LANE)
    bytes_accessed = (b_pad * state_dim * 4            # x (f32 in)
                      + b_pad * LANE * 4               # padded output (f32)
                      + (w1.size + w2.size + w3p.size) * 2
                      + (b1.size + b2.size + b3p.size) * 4)

    out_padded = pl.pallas_call(
        _qnet_kernel,
        out_shape=jax.ShapeDtypeStruct((b_pad, LANE), jnp.float32),
        grid=grid,
        in_specs=[
            pl.BlockSpec((tb, state_dim), lambda i: (i, 0)),   # x tile walks batch
            weight_spec(w1.shape),                             # VMEM-resident weights
            weight_spec(b1.shape),
            weight_spec(w2.shape),
            weight_spec(b2.shape),
            weight_spec(w3p.shape),
            weight_spec(b3p.shape),
        ],
        out_specs=pl.BlockSpec((tb, LANE), lambda i: (i, 0)),
        compiler_params=pltpu.CompilerParams(
            dimension_semantics=("parallel",)),
        cost_estimate=pl.CostEstimate(
            flops=flops, transcendentals=0, bytes_accessed=bytes_accessed),
    )(x, w1, b1, w2, b2, w3p, b3p)

    return out_padded[:batch, :num_actions]


def init_qnetwork_params(key, state_dim=4, hidden=64, num_actions=2):
    """Deterministic init matching nn.Linear's U(-1/sqrt(fan_in), 1/sqrt(fan_in))."""
    ks = jax.random.split(key, 6)

    def linear(kw, kb, fan_in, fan_out):
        bound = 1.0 / jnp.sqrt(jnp.float32(fan_in))
        w = jax.random.uniform(kw, (fan_in, fan_out), jnp.float32, -bound, bound)
        b = jax.random.uniform(kb, (1, fan_out), jnp.float32, -bound, bound)
        return w, b

    w1, b1 = linear(ks[0], ks[1], state_dim, hidden)
    w2, b2 = linear(ks[2], ks[3], hidden, hidden)
    w3, b3 = linear(ks[4], ks[5], hidden, num_actions)
    return {"w1": w1, "b1": b1, "w2": w2, "b2": b2, "w3": w3, "b3": b3}


def _reference_forward(x, p):
    h1 = jnp.maximum(x @ p["w1"] + p["b1"], 0.0)
    h2 = jnp.maximum(h1 @ p["w2"] + p["b2"], 0.0)
    return h2 @ p["w3"] + p["b3"]


if __name__ == "__main__":
    key = jax.random.PRNGKey(0)
    k_params, k_x, k_xbig = jax.random.split(key, 3)

    state_dim, num_actions, batch = 4, 2, 8
    params = init_qnetwork_params(k_params, state_dim=state_dim,
                                  hidden=64, num_actions=num_actions)
    x = jax.random.normal(k_x, (batch, state_dim), jnp.float32)

    q_vals = jax.block_until_ready(qnetwork_forward(x, params))
    ref = _reference_forward(x, params)
    assert q_vals.shape == (batch, num_actions)
    # bf16 MXU inputs with f32 accumulation -> loosened tolerance.
    assert jnp.allclose(q_vals, ref, atol=2e-2, rtol=2e-2)

    # Also exercise the batched (replay-buffer-sized) path with an odd batch.
    x_big = jax.random.normal(k_xbig, (3000, state_dim), jnp.float32)
    q_big = jax.block_until_ready(qnetwork_forward(x_big, params))
    ref_big = _reference_forward(x_big, params)
    assert q_big.shape == (3000, num_actions)
    assert jnp.allclose(q_big, ref_big, atol=2e-2, rtol=2e-2)

    print("KERNEL_OK")
</pallas_src>

<mosaic_0001>
module attributes {stable_mosaic.version = 11 : i64} {
  func.func @_qnet_kernel(%arg0: i32, %arg1: memref<8x4xf32, #tpu.memory_space<vmem>>, %arg2: memref<4x64xbf16, #tpu.memory_space<vmem>>, %arg3: memref<1x64xf32, #tpu.memory_space<vmem>>, %arg4: memref<64x64xbf16, #tpu.memory_space<vmem>>, %arg5: memref<1x64xf32, #tpu.memory_space<vmem>>, %arg6: memref<64x128xbf16, #tpu.memory_space<vmem>>, %arg7: memref<1x128xf32, #tpu.memory_space<vmem>>, %arg8: memref<8x128xf32, #tpu.memory_space<vmem>>) attributes {dimension_semantics = [#tpu.dimension_semantics<parallel>], iteration_bounds = array<i64: 1>, scalar_prefetch = 0 : i64, scratch_operands = 0 : i64, tpu.core_type = #tpu.core_type<tc>, window_params = [{transform_indices = @transform_0, window_bounds = array<i64: 8, 4>}, {pipeline_mode = #tpu.pipeline_mode<synchronous>, transform_indices = @transform_1, window_bounds = array<i64: 4, 64>}, {pipeline_mode = #tpu.pipeline_mode<synchronous>, transform_indices = @transform_2, window_bounds = array<i64: 1, 64>}, {pipeline_mode = #tpu.pipeline_mode<synchronous>, transform_indices = @transform_3, window_bounds = array<i64: 64, 64>}, {pipeline_mode = #tpu.pipeline_mode<synchronous>, transform_indices = @transform_4, window_bounds = array<i64: 1, 64>}, {pipeline_mode = #tpu.pipeline_mode<synchronous>, transform_indices = @transform_5, window_bounds = array<i64: 64, 128>}, {pipeline_mode = #tpu.pipeline_mode<synchronous>, transform_indices = @transform_6, window_bounds = array<i64: 1, 128>}, {transform_indices = @transform_7, window_bounds = array<i64: 8, 128>}]} {
    %c0 = arith.constant 0 : index
    %c0_0 = arith.constant 0 : index
    %0 = vector.load %arg1[%c0, %c0_0] : memref<8x4xf32, #tpu.memory_space<vmem>>, vector<8x4xf32>
    %1 = arith.truncf %0 : vector<8x4xf32> to vector<8x4xbf16>
    %c0_1 = arith.constant 0 : index
    %c0_2 = arith.constant 0 : index
    %2 = vector.load %arg2[%c0_1, %c0_2] : memref<4x64xbf16, #tpu.memory_space<vmem>>, vector<4x64xbf16>
    %cst = arith.constant dense<0.000000e+00> : vector<8x64xf32>
    %3 = tpu.matmul %1, %2, %cst {dimension_numbers = #tpu.dot_dimension_numbers<[1], [0], [0], [1], [0, 0, 1, 1], [], []>} : vector<8x4xbf16>, vector<4x64xbf16>, vector<8x64xf32> -> vector<8x64xf32>
    %c0_3 = arith.constant 0 : index
    %c0_4 = arith.constant 0 : index
    %4 = vector.load %arg3[%c0_3, %c0_4] : memref<1x64xf32, #tpu.memory_space<vmem>>, vector<1x64xf32>
    %5 = vector.broadcast %4 : vector<1x64xf32> to vector<8x64xf32>
    %6 = arith.addf %3, %5 : vector<8x64xf32>
    %cst_5 = arith.constant 0.000000e+00 : f32
    %7 = vector.broadcast %cst_5 : f32 to vector<8x64xf32>
    %8 = arith.maximumf %6, %7 : vector<8x64xf32>
    %9 = arith.truncf %8 : vector<8x64xf32> to vector<8x64xbf16>
    %c0_6 = arith.constant 0 : index
    %c0_7 = arith.constant 0 : index
    %10 = vector.load %arg4[%c0_6, %c0_7] : memref<64x64xbf16, #tpu.memory_space<vmem>>, vector<64x64xbf16>
    %cst_8 = arith.constant dense<0.000000e+00> : vector<8x64xf32>
    %11 = tpu.matmul %9, %10, %cst_8 {dimension_numbers = #tpu.dot_dimension_numbers<[1], [0], [0], [1], [0, 0, 1, 1], [], []>} : vector<8x64xbf16>, vector<64x64xbf16>, vector<8x64xf32> -> vector<8x64xf32>
    %c0_9 = arith.constant 0 : index
    %c0_10 = arith.constant 0 : index
    %12 = vector.load %arg5[%c0_9, %c0_10] : memref<1x64xf32, #tpu.memory_space<vmem>>, vector<1x64xf32>
    %13 = vector.broadcast %12 : vector<1x64xf32> to vector<8x64xf32>
    %14 = arith.addf %11, %13 : vector<8x64xf32>
    %cst_11 = arith.constant 0.000000e+00 : f32
    %15 = vector.broadcast %cst_11 : f32 to vector<8x64xf32>
    %16 = arith.maximumf %14, %15 : vector<8x64xf32>
    %17 = arith.truncf %16 : vector<8x64xf32> to vector<8x64xbf16>
    %c0_12 = arith.constant 0 : index
    %c0_13 = arith.constant 0 : index
    %18 = vector.load %arg6[%c0_12, %c0_13] : memref<64x128xbf16, #tpu.memory_space<vmem>>, vector<64x128xbf16>
    %cst_14 = arith.constant dense<0.000000e+00> : vector<8x128xf32>
    %19 = tpu.matmul %17, %18, %cst_14 {dimension_numbers = #tpu.dot_dimension_numbers<[1], [0], [0], [1], [0, 0, 1, 1], [], []>} : vector<8x64xbf16>, vector<64x128xbf16>, vector<8x128xf32> -> vector<8x128xf32>
    %c0_15 = arith.constant 0 : index
    %c0_16 = arith.constant 0 : index
    %20 = vector.load %arg7[%c0_15, %c0_16] : memref<1x128xf32, #tpu.memory_space<vmem>>, vector<1x128xf32>
    %21 = vector.broadcast %20 : vector<1x128xf32> to vector<8x128xf32>
    %22 = arith.addf %19, %21 : vector<8x128xf32>
    %c0_17 = arith.constant 0 : index
    %c0_18 = arith.constant 0 : index
    %23 = vector.load %arg8[%c0_17, %c0_18] : memref<8x128xf32, #tpu.memory_space<vmem>>, vector<8x128xf32>
    tpu.vector_store %arg8[%c0_17, %c0_18], %22 {strides = array<i32>} : memref<8x128xf32, #tpu.memory_space<vmem>>, vector<8x128xf32>,
    return
  }
  func.func @transform_0(%arg0: i32) -> (i32, i32) {
    %c0_i32 = arith.constant 0 : i32
    %c0_i32_0 = arith.constant 0 : i32
    return %arg0, %c0_i32 : i32, i32
  }
  func.func @transform_1(%arg0: i32) -> (i32, i32) {
    %c0_i32 = arith.constant 0 : i32
    %c0_i32_0 = arith.constant 0 : i32
    %c0_i32_1 = arith.constant 0 : i32
    return %c0_i32, %c0_i32_0 : i32, i32
  }
  func.func @transform_2(%arg0: i32) -> (i32, i32) {
    %c0_i32 = arith.constant 0 : i32
    %c0_i32_0 = arith.constant 0 : i32
    %c0_i32_1 = arith.constant 0 : i32
    return %c0_i32, %c0_i32_0 : i32, i32
  }
  func.func @transform_3(%arg0: i32) -> (i32, i32) {
    %c0_i32 = arith.constant 0 : i32
    %c0_i32_0 = arith.constant 0 : i32
    %c0_i32_1 = arith.constant 0 : i32
    return %c0_i32, %c0_i32_0 : i32, i32
  }
  func.func @transform_4(%arg0: i32) -> (i32, i32) {
    %c0_i32 = arith.constant 0 : i32
    %c0_i32_0 = arith.constant 0 : i32
    %c0_i32_1 = arith.constant 0 : i32
    return %c0_i32, %c0_i32_0 : i32, i32
  }
  func.func @transform_5(%arg0: i32) -> (i32, i32) {
    %c0_i32 = arith.constant 0 : i32
    %c0_i32_0 = arith.constant 0 : i32
    %c0_i32_1 = arith.constant 0 : i32
    return %c0_i32, %c0_i32_0 : i32, i32
  }
  func.func @transform_6(%arg0: i32) -> (i32, i32) {
    %c0_i32 = arith.constant 0 : i32
    %c0_i32_0 = arith.constant 0 : i32
    %c0_i32_1 = arith.constant 0 : i32
    return %c0_i32, %c0_i32_0 : i32, i32
  }
  func.func @transform_7(%arg0: i32) -> (i32, i32) {
    %c0_i32 = arith.constant 0 : i32
    %c0_i32_0 = arith.constant 0 : i32
    return %arg0, %c0_i32 : i32, i32
  }
}

</mosaic_0001>

<bundles_post_ra>
// kernel: qnetwork_forward.1
= control target key start
LH: loop header
LB: loop body
LE: loop exit
PB: predicated region body
PF: predicated region fallthrough
CT: control target
= control target key end

     0   :  { %vm41_vm0 = vcmask 1041408   ;;  %v325_v0 = vmov 0.0   ;;  %vm326_vm1 = vmmov 0   ;;  %vm37_vm2 = vcmask 31744   ;;  %s411_s1 = inlined_call_operand.vmem [shape: bf16[4,64], index: 1, kind: input, shape index: {}]   ;;  %s412_s0 = inlined_call_operand.vmem [shape: f32[8,4], index: 0, kind: input, shape index: {}]   ;;  %s413_s3 = inlined_call_operand.vmem [shape: bf16[64,64], index: 3, kind: input, shape index: {}]   ;;  %s414_s5 = inlined_call_operand.vmem [shape: bf16[64,128], index: 5, kind: input, shape index: {}]   ;;  %s415_s2 = inlined_call_operand.vmem [shape: f32[1,64], index: 2, kind: input, shape index: {}]   ;;  %s416_s4 = inlined_call_operand.vmem [shape: f32[1,64], index: 4, kind: input, shape index: {}]   ;;  %s417_s6 = inlined_call_operand.vmem [shape: f32[1,128], index: 6, kind: input, shape index: {}]   ;;  %s418_s7 = inlined_call_operand.vmem [shape: f32[8,128], index: 7, kind: output, shape index: {}]  }
   0x1   :  { %285 = vmatprep.subr.bf16.mxu0 %v325_v0  ;;  %v29_v1 = vld [vmem:[%s411_s1] sm:$0x3]  ;;  %287 = vmatprep.mubr.msk.bf16.mxu0 %vm326_vm1, %v325_v0  ;;  %v318_v6 = vld [vmem:[%s413_s3 + $0x8] sm:$0xff]   ;;  %v319_v7 = vld [vmem:[%s413_s3 + $0x10] sm:$0xff]   ;;  %vm126_vm3 = vcmask 523264  }
   0x2   :  { %v27_v2 = vld [vmem:[%s412_s0] sm:$0xff]  ;;  %v43_v3 = vsel %vm41_vm0, %v29_v1, 0  ;;  %291 = vmatprep.subr.bf16.mxu1 %v325_v0  ;;  %299 = vmatprep.mubr.msk.bf16.mxu1 %vm326_vm1, %v325_v0  ;;  %v320_v8 = vld [vmem:[%s413_s3 + $0x18] sm:$0xff]   ;;  %v322_v10 = vld [vmem:[%s414_s5 + $0x8] sm:$0xff]  }
   0x3   :  { %v28_v4 = vpack.c.bf16 %v27_v2, %v27_v2  ;;  %v317_v5 = vld [vmem:[%s413_s3] sm:$0xff]   ;;  %286 = vmatpush3.bf16.msra.mxu0 %v43_v3  ;;  %v323_v19 = vld [vmem:[%s414_s5 + $0x10] sm:$0xff]   ;;  %v324_v20 = vld [vmem:[%s414_s5 + $0x18] sm:$0xff]  }
   0x4   :  { %292 = vmatpush3.bf16.msra.mxu1 %v317_v5  ;;  %303 = vmatprep.subr.bf16.mxu0 %v325_v0  ;;  %v321_v9 = vld [vmem:[%s414_s5] sm:$0xff]  }
   0x5   :  { %293 = vmatprep.subr.bf16.mxu1 %v325_v0  ;;  %v259_v11 = vld [vmem:[%s415_s2] ss:$0 sm:$0xff] }
   0x6   :  { %288 = vmatmul.mubr.msk.bf16.vlgmr.msra.gmra.mrb[0].mxu0 %vm37_vm2, %v28_v4  ;;  %v261_v21 = vld [vmem:[%s416_s4] ss:$0 sm:$0xff] }
   0x7   :  { %311 = vmatprep.mubr.msk.bf16.mxu0 %vm326_vm1, %v325_v0  ;;  %304 = vmatpush3.bf16.msra.mxu0 %v321_v9  ;;  %v267_v29 = vld [vmem:[%s417_s6] ss:$0 sm:$0xff] }
   0x8   :  { %294 = vmatpush3.bf16.msra.mxu1 %v318_v6  ;;  %305 = vmatprep.subr.bf16.mxu0 %v325_v0 }
   0x9   :  { %295 = vmatprep.subr.bf16.mxu1 %v325_v0 }
   0xb   :  { %306 = vmatpush3.bf16.msra.mxu0 %v322_v10 }
   0xc   :  { %296 = vmatpush3.bf16.msra.mxu1 %v319_v7  ;;  %307 = vmatprep.subr.bf16.mxu0 %v325_v0 }
   0xd   :  { %297 = vmatprep.subr.bf16.mxu1 %v325_v0 }
   0xf   :  { %308 = vmatpush3.bf16.msra.mxu0 %v323_v19 }
  0x10   :  { %298 = vmatpush3.bf16.msra.mxu1 %v320_v8  ;;  %309 = vmatprep.subr.bf16.mxu0 %v325_v0 }
  0x13   :  { %310 = vmatpush3.bf16.msra.mxu0 %v324_v20 }
  0xd9   :  { %v79_v12 = vpop.f32.mrb[0].mxu0 }
  0xda   :  { %v80_v13 = vadd.f32 %v259_v11, %v79_v12  ;;  %v289_v14 = vpop.f32.mrb[1].mxu0 }
  0xdb   :  { %v82_v15 = vpop.f32.mrb[2].mxu0 }
  0xdc   :  { %v85_v16 = vmax.f32 %v80_v13, 0.0  ;;  %v290_v17 = vpop.f32.mrb[3].mxu0 }
  0xde   :  { %v86_v18 = vpack.c.bf16 %v85_v16, %v85_v16 }
  0xe0   :  { %300 = vmatmul.mubr.msk.bf16.vlgmr.msra.gmra.mrb[0].mxu1 %vm126_vm3, %v86_v18 }
 0x1b3   :  { %v164_v22 = vpop.f32.mrb[0].mxu1 }
 0x1b4   :  { %v165_v23 = vadd.f32 %v261_v21, %v164_v22  ;;  %v301_v24 = vpop.f32.mrb[1].mxu1 }
 0x1b5   :  { %v167_v25 = vpop.f32.mrb[2].mxu1 }
 0x1b6   :  { %v170_v26 = vmax.f32 %v165_v23, 0.0  ;;  %v302_v27 = vpop.f32.mrb[3].mxu1 }
 0x1b8   :  { %v171_v28 = vpack.c.bf16 %v170_v26, %v170_v26 }
 0x1ba   :  { %312 = vmatmul.mubr.msk.bf16.vlgmr.msra.gmra.mrb[4].mxu0 %vm126_vm3, %v171_v28 }
 0x28d   :  { %v248_v30 = vpop.f32.mrb[4].mxu0 }
 0x28e   :  { %v249_v31 = vadd.f32 %v267_v29, %v248_v30  ;;  %v313_v32 = vpop.f32.mrb[5].mxu0 }
 0x28f   :  { %v251_v33 = vpop.f32.mrb[6].mxu0 }
 0x290   :  { %254 = vst [vmem:[%s418_s7] sm:$0xff] %v249_v31  ;;  %v314_v34 = vpop.f32.mrb[7].mxu0 }

</bundles_post_ra>
